<compile_context>
chip_gen: v7x
topology: tpu7x:2x2x1
jax: 0.10.0
libtpu: 0.0.40
codegen_flags: <defaults>
</compile_context>

<pallas_src>
from functools import partial
import inspect

import jax
import jax.numpy as jnp
from jax import lax
from jax.experimental import pallas as pl
from jax.experimental.pallas import tpu as pltpu


# ----------------------------------------------------------------------------
# Small trace-time helpers (device introspection, tile / padding arithmetic).
# ----------------------------------------------------------------------------

def _round_up(x, m):
    return ((x + m - 1) // m) * m


def _blockspec_has_pipeline_mode():
    try:
        return hasattr(pl, "Buffered") and (
            "pipeline_mode" in inspect.signature(pl.BlockSpec).parameters)
    except Exception:
        return False


def _vmem_limit_bytes():
    """Scoped-VMEM budget: physical capacity minus headroom for compiler scratch
    and spills.  v5e/v6e (128 MiB) -> 96 MiB, v7x (64 MiB) -> 40 MiB."""
    cap = 64 * 1024 * 1024                      # conservative fallback (v7x-sized)
    try:
        cap = int(pltpu.get_tpu_info().vmem_capacity_bytes)
    except Exception:
        pass
    return int(max(16 * 1024 * 1024,
                   min(cap - 24 * 1024 * 1024, int(cap * 0.75))))


def _num_tensorcores():
    """Best-effort TensorCore count per device (v7x has 2); falls back to 1."""
    try:
        info = pltpu.get_tpu_info()
        for attr in ("num_cores", "core_count", "num_tensorcores", "tensorcore_count"):
            v = getattr(info, attr, None)
            if v:
                return int(v)
    except Exception:
        pass
    try:
        dev = jax.devices()[0]
        for attr in ("num_cores", "core_count"):
            v = getattr(dev, attr, None)
            if v:
                return int(v)
    except Exception:
        pass
    return 1


def _largest_aligned_divisor(dim, cap, align=1):
    """Largest divisor of `dim` that is <= cap and a multiple of `align`; falls
    back to the full dim (a block equal to the whole array is always legal)."""
    cap = min(int(cap), dim)
    for d in range(cap, 0, -1):
        if dim % d == 0 and d % align == 0:
            return d
    return dim


def _t_tile_cap(tB, H, x_bytes, hs_bytes, whh_bytes, whh_single_buffered,
                budget_bytes):
    """Largest time tile such that kernel 1's VMEM working set fits the budget:
    double-buffered x_proj block + double-buffered hs block + W_hh^T + the f32
    hidden-state scratch, plus slack for compiler temporaries."""
    fixed = (1 if whh_single_buffered else 2) * H * H * whh_bytes
    fixed += tB * H * 4                       # f32 hidden-state scratch
    fixed += 2 * 1024 * 1024                  # slack
    per_t = 2 * tB * H * (x_bytes + hs_bytes)  # 2x (double-buffered) in + out
    return int(max(8, (budget_bytes - fixed) // per_t))


# ----------------------------------------------------------------------------
# Kernels
# ----------------------------------------------------------------------------

def rnn_recurrence_kernel(xproj_ref, whh_t_ref, hs_ref, h_scratch):
    """Serial tanh recurrence over one (batch tile, time tile).

    xproj_ref: (tT, tB, H)  x_t @ W_ih^T + b_ih + b_hh  (compute dtype)
    whh_t_ref: (H, H)       W_hh^T                       (compute dtype)
    hs_ref:    (tT, tB, H)  hidden states out            (compute dtype)
    h_scratch: (tB, H) f32  hidden state carried across the time grid axis
    """
    @pl.when(pl.program_id(1) == 0)           # first time tile of this batch tile
    def _():
        h_scratch[...] = jnp.zeros_like(h_scratch)

    whh_t = whh_t_ref[...]
    t_tile = xproj_ref.shape[0]

    def step(t, h):
        x = xproj_ref[t].astype(jnp.float32)                      # (tB, H)
        hh = jnp.dot(h.astype(whh_t.dtype), whh_t,
                     preferred_element_type=jnp.float32)          # MXU, f32 acc
        h_new = jnp.tanh(x + hh)                                  # VPU + EUP, f32
        hs_ref[t] = h_new.astype(hs_ref.dtype)
        return h_new

    # Fixed partial unroll: hides the x load / hs store and scalar loop overhead
    # under the matmul+tanh dependency chain without full-unroll vreg blowup.
    unroll = 8 if t_tile % 8 == 0 else (4 if t_tile % 4 == 0 else 1)
    h_scratch[...] = lax.fori_loop(0, t_tile, step, h_scratch[...], unroll=unroll)


def output_proj_kernel(hs_ref, wout_t_ref, bout_ref, out_ref):
    """hs_ref: (tm, H), wout_t_ref: (H, tn), bout_ref: (1, tn), out_ref: (tm, tn)."""
    acc = jnp.dot(hs_ref[...].astype(wout_t_ref.dtype), wout_t_ref[...],
                  preferred_element_type=jnp.float32)             # MXU, f32 acc
    out_ref[...] = (acc + bout_ref[...]).astype(out_ref.dtype)


# ----------------------------------------------------------------------------
# Forward wrapper
# ----------------------------------------------------------------------------

@partial(jax.jit, static_argnames=("compute_dtype", "logits_dtype", "t_tile",
                                   "b_tile", "m_tile", "n_tile", "torch_layout"))
def lm_rnn_forward(tokens, params, *, compute_dtype=jnp.bfloat16,
                   logits_dtype=None, t_tile=None, b_tile=None,
                   m_tile=512, n_tile=1024, torch_layout=True):
    """tokens: (T, B) int32 (time-major, like nn.RNN batch_first=False).
    Returns logits in the PyTorch layout (T, V, B) (or (T, B, V) if
    torch_layout=False)."""
    emb_table = params["emb"]                 # (V, E)
    W_ih, W_hh = params["w_ih"], params["w_hh"]
    b_ih, b_hh = params["b_ih"], params["b_hh"]
    W_out, b_out = params["w_out"], params["b_out"]

    T, B = tokens.shape
    V, _E = emb_table.shape
    H = W_hh.shape[0]
    compute_dtype = jnp.dtype(compute_dtype)
    logits_dtype = jnp.dtype(compute_dtype if logits_dtype is None else logits_dtype)

    vmem_limit = _vmem_limit_bytes()

    # --- glue: pad shapes so every block is sublane/lane aligned (unmasked vregs
    # and unmasked lane-dense stores), then slice the padding away at the end.
    T_pad = _round_up(T, 8)
    B_pad = _round_up(max(B, 16), 16)
    V_pad = _round_up(V, 128)
    tokens_p = jnp.pad(tokens, ((0, T_pad - T), (0, B_pad - B)))  # pad token = 0 (valid row)

    # --- glue: fuse embedding + input projection + both RNN biases into one table.
    # Row `pad_index` of emb_table is zero, so its projected row is exactly
    # b_ih + b_hh, matching the reference math for pad tokens.  The table (hence
    # the gathered x_proj stream) is kept in compute_dtype; add+tanh upcast to f32
    # inside the kernel.
    emb_proj_table = (emb_table @ W_ih.T + b_ih + b_hh).astype(compute_dtype)  # (V, H)
    x_proj = jnp.take(emb_proj_table, tokens_p, axis=0)                        # (T_pad, B_pad, H)

    # Pre-transposed, MXU-dtype weights (lane-dense; no in-kernel XLU transposes).
    whh_t = W_hh.T.astype(compute_dtype)                                       # (H, H)
    wout_t = jnp.pad(W_out, ((0, V_pad - V), (0, 0))).T.astype(compute_dtype)  # (H, V_pad)
    b_out_p = jnp.pad(b_out, ((0, 0), (0, V_pad - V))).astype(jnp.float32)     # (1, V_pad)

    # --- kernel 1: serial recurrence, grid = (batch tiles, time tiles).
    # Batch tiles are independent -> "parallel" (shards across the 2 TensorCores
    # on v7x); time is the serial carry axis -> "arbitrary", kept last.
    b_align = 16 if compute_dtype.itemsize < 4 else 8
    if b_tile is None:
        n_cores = _num_tensorcores()
        b_tile = B_pad // 2 if (n_cores >= 2 and B_pad % (2 * b_align) == 0) else B_pad
    tB = _largest_aligned_divisor(B_pad, b_tile, align=b_align)

    whh_bytes = whh_t.dtype.itemsize
    whh_single = (H * H * whh_bytes >= (1 << 20)) and _blockspec_has_pipeline_mode()
    if t_tile is None:
        t_tile = _t_tile_cap(tB, H, compute_dtype.itemsize, compute_dtype.itemsize,
                             whh_bytes, whh_single, vmem_limit)
    tT = _largest_aligned_divisor(T_pad, t_tile)

    # W_hh^T is grid-invariant: single-buffer it when it is big enough to matter
    # (saves H*H*itemsize VMEM that goes to a larger time tile instead).
    whh_kwargs = {"pipeline_mode": pl.Buffered(1)} if whh_single else {}

    hs = pl.pallas_call(
        rnn_recurrence_kernel,
        out_shape=jax.ShapeDtypeStruct((T_pad, B_pad, H), compute_dtype),
        grid_spec=pltpu.PrefetchScalarGridSpec(
            num_scalar_prefetch=0,
            grid=(B_pad // tB, T_pad // tT),
            in_specs=[pl.BlockSpec((tT, tB, H), lambda b, t: (t, b, 0)),
                      pl.BlockSpec((H, H), lambda b, t: (0, 0), **whh_kwargs)],
            out_specs=pl.BlockSpec((tT, tB, H), lambda b, t: (t, b, 0)),
            scratch_shapes=[pltpu.VMEM((tB, H), jnp.float32)]),
        compiler_params=pltpu.CompilerParams(
            dimension_semantics=("parallel", "arbitrary"),
            vmem_limit_bytes=vmem_limit),
    )(x_proj, whh_t)

    # --- kernel 2: output projection as a tiled (M, H) @ (H, V_pad) matmul,
    # both grid axes parallel (uses both TensorCores on v7x).
    M = T_pad * B_pad
    hs2 = hs.reshape(M, H)
    tm = _largest_aligned_divisor(M, m_tile, align=8)
    tn = _largest_aligned_divisor(V_pad, n_tile, align=128)

    # Pick the grid order so the operand that gets fully re-streamed over the
    # other axis is the cheaper one (W_out re-read M/tm times vs hs V_pad/tn times).
    restream_w = (M // tm) * V_pad * H * wout_t.dtype.itemsize
    restream_h = (V_pad // tn) * M * H * hs2.dtype.itemsize
    if restream_w <= restream_h:
        grid2 = (M // tm, V_pad // tn)     # V innermost: hs tile stays resident
        hs_map = lambda i, j: (i, 0)
        w_map = lambda i, j: (0, j)
        o_map = lambda i, j: (i, j)
    else:
        grid2 = (V_pad // tn, M // tm)     # M innermost: W_out tile stays resident
        hs_map = lambda j, i: (i, 0)
        w_map = lambda j, i: (0, j)
        o_map = lambda j, i: (i, j)

    logits = pl.pallas_call(
        output_proj_kernel,
        out_shape=jax.ShapeDtypeStruct((M, V_pad), logits_dtype),
        grid_spec=pltpu.PrefetchScalarGridSpec(
            num_scalar_prefetch=0,
            grid=grid2,
            in_specs=[pl.BlockSpec((tm, H), hs_map),
                      pl.BlockSpec((H, tn), w_map),
                      pl.BlockSpec((1, tn), w_map)],
            out_specs=pl.BlockSpec((tm, tn), o_map)),
        compiler_params=pltpu.CompilerParams(
            dimension_semantics=("parallel", "parallel"),
            vmem_limit_bytes=vmem_limit),
    )(hs2, wout_t, b_out_p)

    logits = logits.reshape(T_pad, B_pad, V_pad)[:T, :B, :V]        # (T, B, V)
    if torch_layout:
        # PyTorch module returns logits.permute(0, 2, 1) -> (T, V, B).
        # TODO(synk): drop this transpose if the consumer accepts (T, B, V) directly.
        return jnp.transpose(logits, (0, 2, 1))
    return logits


# ----------------------------------------------------------------------------
# Parameter init + pure-JAX reference (mirrors the PyTorch module)
# ----------------------------------------------------------------------------

def init_params(key, emb_size, hidden_size, output_size, pad_index=0):
    k_emb, k_wih, k_whh, k_bih, k_bhh, k_wo, k_bo = jax.random.split(key, 7)
    # nn.Embedding: N(0,1), padding row zeroed.
    emb = jax.random.normal(k_emb, (output_size, emb_size), jnp.float32)
    emb = emb.at[pad_index].set(0.0)
    # nn.RNN / nn.Linear: U(-1/sqrt(fan), 1/sqrt(fan)).
    s = 1.0 / jnp.sqrt(hidden_size)
    u = lambda k, shape: jax.random.uniform(k, shape, jnp.float32, -s, s)
    return {
        "emb": emb,
        "w_ih": u(k_wih, (hidden_size, emb_size)),
        "w_hh": u(k_whh, (hidden_size, hidden_size)),
        "b_ih": u(k_bih, (1, hidden_size)),
        "b_hh": u(k_bhh, (1, hidden_size)),
        "w_out": u(k_wo, (output_size, hidden_size)),
        "b_out": u(k_bo, (1, output_size)),
    }


def lm_rnn_reference(tokens, params):
    """Pure-JAX reference mirroring the PyTorch forward (all f32)."""
    emb = jnp.take(params["emb"], tokens, axis=0)                 # (T, B, E)
    _T, B, _ = emb.shape
    H = params["w_hh"].shape[0]

    def step(h, x_t):
        h_new = jnp.tanh(x_t @ params["w_ih"].T + params["b_ih"]
                         + h @ params["w_hh"].T + params["b_hh"])
        return h_new, h_new

    _, hs = lax.scan(step, jnp.zeros((B, H), jnp.float32), emb)   # (T, B, H)
    logits = hs @ params["w_out"].T + params["b_out"]             # (T, B, V)
    return jnp.transpose(logits, (0, 2, 1))                       # (T, V, B)


if __name__ == "__main__":
    emb_size, hidden_size, output_size = 16, 32, 32   # vocab == output_size
    T, B, pad_index = 8, 2, 0

    key = jax.random.PRNGKey(0)
    k_params, k_tok = jax.random.split(key)
    params = init_params(k_params, emb_size, hidden_size, output_size, pad_index)
    tokens = jax.random.randint(k_tok, (T, B), 0, output_size, dtype=jnp.int32)

    ref = jax.block_until_ready(lm_rnn_reference(tokens, params))

    # Strict check: all-f32 path (exactly mirrors the PyTorch math).
    out_f32 = jax.block_until_ready(
        lm_rnn_forward(tokens, params, compute_dtype=jnp.float32))
    assert out_f32.shape == (T, output_size, B), out_f32.shape
    assert jnp.allclose(out_f32, ref, atol=1e-4, rtol=1e-4), "f32 mismatch vs reference"

    # Production config: bf16 MXU operands / HBM streams, f32 accumulate + tanh.
    out_bf16 = jax.block_until_ready(
        lm_rnn_forward(tokens, params, compute_dtype=jnp.bfloat16))
    assert out_bf16.shape == (T, output_size, B), out_bf16.shape
    assert jnp.max(jnp.abs(out_bf16.astype(jnp.float32) - ref)) < 0.1, \
        "bf16 path drifted too far"

    print("KERNEL_OK")
</pallas_src>

<mosaic_0001>
module attributes {stable_mosaic.version = 11 : i64} {
  func.func @rnn_recurrence_kernel(%arg0: i32, %arg1: i32, %arg2: memref<8x16x32xf32, #tpu.memory_space<vmem>>, %arg3: memref<32x32xf32, #tpu.memory_space<vmem>>, %arg4: memref<8x16x32xf32, #tpu.memory_space<vmem>>, %arg5: memref<16x32xf32, #tpu.memory_space<vmem>>) attributes {dimension_semantics = [#tpu.dimension_semantics<parallel>, #tpu.dimension_semantics<arbitrary>], iteration_bounds = array<i64: 1, 1>, scalar_prefetch = 0 : i64, scratch_operands = 1 : i64, tpu.core_type = #tpu.core_type<tc>, window_params = [{transform_indices = @transform_0, window_bounds = array<i64: 8, 16, 32>}, {pipeline_mode = #tpu.pipeline_mode<synchronous>, transform_indices = @transform_1, window_bounds = array<i64: 32, 32>}, {transform_indices = @transform_2, window_bounds = array<i64: 8, 16, 32>}]} {
    %c0_i32 = arith.constant 0 : i32
    %0 = arith.cmpi eq, %arg1, %c0_i32 : i32
    %1 = arith.extui %0 : i1 to i32
    %c0_i32_0 = arith.constant 0 : i32
    %2 = arith.cmpi ne, %1, %c0_i32_0 : i32
    scf.if %2 {
      %cst_46 = arith.constant 0.000000e+00 : f32
      %86 = vector.broadcast %cst_46 : f32 to vector<16x32xf32>
      %c0_47 = arith.constant 0 : index
      %c0_48 = arith.constant 0 : index
      %87 = vector.load %arg5[%c0_47, %c0_48] : memref<16x32xf32, #tpu.memory_space<vmem>>, vector<16x32xf32>
      tpu.vector_store %arg5[%c0_47, %c0_48], %86 {strides = array<i32>} : memref<16x32xf32, #tpu.memory_space<vmem>>, vector<16x32xf32>,
    } else {
    }
    %c0 = arith.constant 0 : index
    %c0_1 = arith.constant 0 : index
    %3 = vector.load %arg3[%c0, %c0_1] : memref<32x32xf32, #tpu.memory_space<vmem>>, vector<32x32xf32>
    %c0_2 = arith.constant 0 : index
    %c0_3 = arith.constant 0 : index
    %4 = vector.load %arg5[%c0_2, %c0_3] : memref<16x32xf32, #tpu.memory_space<vmem>>, vector<16x32xf32>
    %c0_i32_4 = arith.constant 0 : i32
    %5 = arith.index_cast %c0_i32_4 : i32 to index
    %c0_5 = arith.constant 0 : index
    %c0_6 = arith.constant 0 : index
    %6 = vector.load %arg2[%5, %c0_5, %c0_6] : memref<8x16x32xf32, #tpu.memory_space<vmem>>, vector<1x16x32xf32>
    %7 = vector.shape_cast %6 : vector<1x16x32xf32> to vector<16x32xf32>
    %cst = arith.constant dense<0.000000e+00> : vector<16x32xf32>
    %8 = tpu.matmul %4, %3, %cst {dimension_numbers = #tpu.dot_dimension_numbers<[1], [0], [0], [1], [0, 0, 1, 1], [], []>} : vector<16x32xf32>, vector<32x32xf32>, vector<16x32xf32> -> vector<16x32xf32>
    %9 = arith.addf %7, %8 : vector<16x32xf32>
    %10 = math.tanh %9 : vector<16x32xf32>
    %11 = arith.index_cast %c0_i32_4 : i32 to index
    %c0_7 = arith.constant 0 : index
    %c0_8 = arith.constant 0 : index
    %12 = vector.load %arg4[%11, %c0_7, %c0_8] : memref<8x16x32xf32, #tpu.memory_space<vmem>>, vector<1x16x32xf32>
    %13 = vector.shape_cast %12 : vector<1x16x32xf32> to vector<16x32xf32>
    %14 = vector.shape_cast %10 : vector<16x32xf32> to vector<1x16x32xf32>
    tpu.vector_store %arg4[%11, %c0_7, %c0_8], %14 {strides = array<i32>} : memref<8x16x32xf32, #tpu.memory_space<vmem>>, vector<1x16x32xf32>,
    %c1_i32 = arith.constant 1 : i32
    %15 = arith.index_cast %c1_i32 : i32 to index
    %c0_9 = arith.constant 0 : index
    %c0_10 = arith.constant 0 : index
    %16 = vector.load %arg2[%15, %c0_9, %c0_10] : memref<8x16x32xf32, #tpu.memory_space<vmem>>, vector<1x16x32xf32>
    %17 = vector.shape_cast %16 : vector<1x16x32xf32> to vector<16x32xf32>
    %cst_11 = arith.constant dense<0.000000e+00> : vector<16x32xf32>
    %18 = tpu.matmul %10, %3, %cst_11 {dimension_numbers = #tpu.dot_dimension_numbers<[1], [0], [0], [1], [0, 0, 1, 1], [], []>} : vector<16x32xf32>, vector<32x32xf32>, vector<16x32xf32> -> vector<16x32xf32>
    %19 = arith.addf %17, %18 : vector<16x32xf32>
    %20 = math.tanh %19 : vector<16x32xf32>
    %21 = arith.index_cast %c1_i32 : i32 to index
    %c0_12 = arith.constant 0 : index
    %c0_13 = arith.constant 0 : index
    %22 = vector.load %arg4[%21, %c0_12, %c0_13] : memref<8x16x32xf32, #tpu.memory_space<vmem>>, vector<1x16x32xf32>
    %23 = vector.shape_cast %22 : vector<1x16x32xf32> to vector<16x32xf32>
    %24 = vector.shape_cast %20 : vector<16x32xf32> to vector<1x16x32xf32>
    tpu.vector_store %arg4[%21, %c0_12, %c0_13], %24 {strides = array<i32>} : memref<8x16x32xf32, #tpu.memory_space<vmem>>, vector<1x16x32xf32>,
    %c2_i32 = arith.constant 2 : i32
    %25 = arith.index_cast %c2_i32 : i32 to index
    %c0_14 = arith.constant 0 : index
    %c0_15 = arith.constant 0 : index
    %26 = vector.load %arg2[%25, %c0_14, %c0_15] : memref<8x16x32xf32, #tpu.memory_space<vmem>>, vector<1x16x32xf32>
    %27 = vector.shape_cast %26 : vector<1x16x32xf32> to vector<16x32xf32>
    %cst_16 = arith.constant dense<0.000000e+00> : vector<16x32xf32>
    %28 = tpu.matmul %20, %3, %cst_16 {dimension_numbers = #tpu.dot_dimension_numbers<[1], [0], [0], [1], [0, 0, 1, 1], [], []>} : vector<16x32xf32>, vector<32x32xf32>, vector<16x32xf32> -> vector<16x32xf32>
    %29 = arith.addf %27, %28 : vector<16x32xf32>
    %30 = math.tanh %29 : vector<16x32xf32>
    %31 = arith.index_cast %c2_i32 : i32 to index
    %c0_17 = arith.constant 0 : index
    %c0_18 = arith.constant 0 : index
    %32 = vector.load %arg4[%31, %c0_17, %c0_18] : memref<8x16x32xf32, #tpu.memory_space<vmem>>, vector<1x16x32xf32>
    %33 = vector.shape_cast %32 : vector<1x16x32xf32> to vector<16x32xf32>
    %34 = vector.shape_cast %30 : vector<16x32xf32> to vector<1x16x32xf32>
    tpu.vector_store %arg4[%31, %c0_17, %c0_18], %34 {strides = array<i32>} : memref<8x16x32xf32, #tpu.memory_space<vmem>>, vector<1x16x32xf32>,
    %c3_i32 = arith.constant 3 : i32
    %35 = arith.index_cast %c3_i32 : i32 to index
    %c0_19 = arith.constant 0 : index
    %c0_20 = arith.constant 0 : index
    %36 = vector.load %arg2[%35, %c0_19, %c0_20] : memref<8x16x32xf32, #tpu.memory_space<vmem>>, vector<1x16x32xf32>
    %37 = vector.shape_cast %36 : vector<1x16x32xf32> to vector<16x32xf32>
    %cst_21 = arith.constant dense<0.000000e+00> : vector<16x32xf32>
    %38 = tpu.matmul %30, %3, %cst_21 {dimension_numbers = #tpu.dot_dimension_numbers<[1], [0], [0], [1], [0, 0, 1, 1], [], []>} : vector<16x32xf32>, vector<32x32xf32>, vector<16x32xf32> -> vector<16x32xf32>
    %39 = arith.addf %37, %38 : vector<16x32xf32>
    %40 = math.tanh %39 : vector<16x32xf32>
    %41 = arith.index_cast %c3_i32 : i32 to index
    %c0_22 = arith.constant 0 : index
    %c0_23 = arith.constant 0 : index
    %42 = vector.load %arg4[%41, %c0_22, %c0_23] : memref<8x16x32xf32, #tpu.memory_space<vmem>>, vector<1x16x32xf32>
    %43 = vector.shape_cast %42 : vector<1x16x32xf32> to vector<16x32xf32>
    %44 = vector.shape_cast %40 : vector<16x32xf32> to vector<1x16x32xf32>
    tpu.vector_store %arg4[%41, %c0_22, %c0_23], %44 {strides = array<i32>} : memref<8x16x32xf32, #tpu.memory_space<vmem>>, vector<1x16x32xf32>,
    %c4_i32 = arith.constant 4 : i32
    %45 = arith.index_cast %c4_i32 : i32 to index
    %c0_24 = arith.constant 0 : index
    %c0_25 = arith.constant 0 : index
    %46 = vector.load %arg2[%45, %c0_24, %c0_25] : memref<8x16x32xf32, #tpu.memory_space<vmem>>, vector<1x16x32xf32>
    %47 = vector.shape_cast %46 : vector<1x16x32xf32> to vector<16x32xf32>
    %cst_26 = arith.constant dense<0.000000e+00> : vector<16x32xf32>
    %48 = tpu.matmul %40, %3, %cst_26 {dimension_numbers = #tpu.dot_dimension_numbers<[1], [0], [0], [1], [0, 0, 1, 1], [], []>} : vector<16x32xf32>, vector<32x32xf32>, vector<16x32xf32> -> vector<16x32xf32>
    %49 = arith.addf %47, %48 : vector<16x32xf32>
    %50 = math.tanh %49 : vector<16x32xf32>
    %51 = arith.index_cast %c4_i32 : i32 to index
    %c0_27 = arith.constant 0 : index
    %c0_28 = arith.constant 0 : index
    %52 = vector.load %arg4[%51, %c0_27, %c0_28] : memref<8x16x32xf32, #tpu.memory_space<vmem>>, vector<1x16x32xf32>
    %53 = vector.shape_cast %52 : vector<1x16x32xf32> to vector<16x32xf32>
    %54 = vector.shape_cast %50 : vector<16x32xf32> to vector<1x16x32xf32>
    tpu.vector_store %arg4[%51, %c0_27, %c0_28], %54 {strides = array<i32>} : memref<8x16x32xf32, #tpu.memory_space<vmem>>, vector<1x16x32xf32>,
    %c5_i32 = arith.constant 5 : i32
    %55 = arith.index_cast %c5_i32 : i32 to index
    %c0_29 = arith.constant 0 : index
    %c0_30 = arith.constant 0 : index
    %56 = vector.load %arg2[%55, %c0_29, %c0_30] : memref<8x16x32xf32, #tpu.memory_space<vmem>>, vector<1x16x32xf32>
    %57 = vector.shape_cast %56 : vector<1x16x32xf32> to vector<16x32xf32>
    %cst_31 = arith.constant dense<0.000000e+00> : vector<16x32xf32>
    %58 = tpu.matmul %50, %3, %cst_31 {dimension_numbers = #tpu.dot_dimension_numbers<[1], [0], [0], [1], [0, 0, 1, 1], [], []>} : vector<16x32xf32>, vector<32x32xf32>, vector<16x32xf32> -> vector<16x32xf32>
    %59 = arith.addf %57, %58 : vector<16x32xf32>
    %60 = math.tanh %59 : vector<16x32xf32>
    %61 = arith.index_cast %c5_i32 : i32 to index
    %c0_32 = arith.constant 0 : index
    %c0_33 = arith.constant 0 : index
    %62 = vector.load %arg4[%61, %c0_32, %c0_33] : memref<8x16x32xf32, #tpu.memory_space<vmem>>, vector<1x16x32xf32>
    %63 = vector.shape_cast %62 : vector<1x16x32xf32> to vector<16x32xf32>
    %64 = vector.shape_cast %60 : vector<16x32xf32> to vector<1x16x32xf32>
    tpu.vector_store %arg4[%61, %c0_32, %c0_33], %64 {strides = array<i32>} : memref<8x16x32xf32, #tpu.memory_space<vmem>>, vector<1x16x32xf32>,
    %c6_i32 = arith.constant 6 : i32
    %65 = arith.index_cast %c6_i32 : i32 to index
    %c0_34 = arith.constant 0 : index
    %c0_35 = arith.constant 0 : index
    %66 = vector.load %arg2[%65, %c0_34, %c0_35] : memref<8x16x32xf32, #tpu.memory_space<vmem>>, vector<1x16x32xf32>
    %67 = vector.shape_cast %66 : vector<1x16x32xf32> to vector<16x32xf32>
    %cst_36 = arith.constant dense<0.000000e+00> : vector<16x32xf32>
    %68 = tpu.matmul %60, %3, %cst_36 {dimension_numbers = #tpu.dot_dimension_numbers<[1], [0], [0], [1], [0, 0, 1, 1], [], []>} : vector<16x32xf32>, vector<32x32xf32>, vector<16x32xf32> -> vector<16x32xf32>
    %69 = arith.addf %67, %68 : vector<16x32xf32>
    %70 = math.tanh %69 : vector<16x32xf32>
    %71 = arith.index_cast %c6_i32 : i32 to index
    %c0_37 = arith.constant 0 : index
    %c0_38 = arith.constant 0 : index
    %72 = vector.load %arg4[%71, %c0_37, %c0_38] : memref<8x16x32xf32, #tpu.memory_space<vmem>>, vector<1x16x32xf32>
    %73 = vector.shape_cast %72 : vector<1x16x32xf32> to vector<16x32xf32>
    %74 = vector.shape_cast %70 : vector<16x32xf32> to vector<1x16x32xf32>
    tpu.vector_store %arg4[%71, %c0_37, %c0_38], %74 {strides = array<i32>} : memref<8x16x32xf32, #tpu.memory_space<vmem>>, vector<1x16x32xf32>,
    %c7_i32 = arith.constant 7 : i32
    %75 = arith.index_cast %c7_i32 : i32 to index
    %c0_39 = arith.constant 0 : index
    %c0_40 = arith.constant 0 : index
    %76 = vector.load %arg2[%75, %c0_39, %c0_40] : memref<8x16x32xf32, #tpu.memory_space<vmem>>, vector<1x16x32xf32>
    %77 = vector.shape_cast %76 : vector<1x16x32xf32> to vector<16x32xf32>
    %cst_41 = arith.constant dense<0.000000e+00> : vector<16x32xf32>
    %78 = tpu.matmul %70, %3, %cst_41 {dimension_numbers = #tpu.dot_dimension_numbers<[1], [0], [0], [1], [0, 0, 1, 1], [], []>} : vector<16x32xf32>, vector<32x32xf32>, vector<16x32xf32> -> vector<16x32xf32>
    %79 = arith.addf %77, %78 : vector<16x32xf32>
    %80 = math.tanh %79 : vector<16x32xf32>
    %81 = arith.index_cast %c7_i32 : i32 to index
    %c0_42 = arith.constant 0 : index
    %c0_43 = arith.constant 0 : index
    %82 = vector.load %arg4[%81, %c0_42, %c0_43] : memref<8x16x32xf32, #tpu.memory_space<vmem>>, vector<1x16x32xf32>
    %83 = vector.shape_cast %82 : vector<1x16x32xf32> to vector<16x32xf32>
    %84 = vector.shape_cast %80 : vector<16x32xf32> to vector<1x16x32xf32>
    tpu.vector_store %arg4[%81, %c0_42, %c0_43], %84 {strides = array<i32>} : memref<8x16x32xf32, #tpu.memory_space<vmem>>, vector<1x16x32xf32>,
    %c8_i32 = arith.constant 8 : i32
    %c0_44 = arith.constant 0 : index
    %c0_45 = arith.constant 0 : index
    %85 = vector.load %arg5[%c0_44, %c0_45] : memref<16x32xf32, #tpu.memory_space<vmem>>, vector<16x32xf32>
    tpu.vector_store %arg5[%c0_44, %c0_45], %80 {strides = array<i32>} : memref<16x32xf32, #tpu.memory_space<vmem>>, vector<16x32xf32>,
    return
  }
  func.func @transform_0(%arg0: i32, %arg1: i32) -> (i32, i32, i32) {
    %c0_i32 = arith.constant 0 : i32
    %c0_i32_0 = arith.constant 0 : i32
    return %arg1, %arg0, %c0_i32 : i32, i32, i32
  }
  func.func @transform_1(%arg0: i32, %arg1: i32) -> (i32, i32) {
    %c0_i32 = arith.constant 0 : i32
    %c0_i32_0 = arith.constant 0 : i32
    %c0_i32_1 = arith.constant 0 : i32
    return %c0_i32, %c0_i32_0 : i32, i32
  }
  func.func @transform_2(%arg0: i32, %arg1: i32) -> (i32, i32, i32) {
    %c0_i32 = arith.constant 0 : i32
    %c0_i32_0 = arith.constant 0 : i32
    return %arg1, %arg0, %c0_i32 : i32, i32, i32
  }
}

module attributes {stable_mosaic.version = 11 : i64} {
  func.func @output_proj_kernel(%arg0: i32, %arg1: i32, %arg2: memref<128x32xf32, #tpu.memory_space<vmem>>, %arg3: memref<32x128xf32, #tpu.memory_space<vmem>>, %arg4: memref<1x128xf32, #tpu.memory_space<vmem>>, %arg5: memref<128x128xf32, #tpu.memory_space<vmem>>) attributes {dimension_semantics = [#tpu.dimension_semantics<parallel>, #tpu.dimension_semantics<parallel>], iteration_bounds = array<i64: 1, 1>, scalar_prefetch = 0 : i64, scratch_operands = 0 : i64, tpu.core_type = #tpu.core_type<tc>, window_params = [{transform_indices = @transform_0, window_bounds = array<i64: 128, 32>}, {transform_indices = @transform_1, window_bounds = array<i64: 32, 128>}, {transform_indices = @transform_2, window_bounds = array<i64: 1, 128>}, {transform_indices = @transform_3, window_bounds = array<i64: 128, 128>}]} {
    %c0 = arith.constant 0 : index
    %c0_0 = arith.constant 0 : index
    %0 = vector.load %arg2[%c0, %c0_0] : memref<128x32xf32, #tpu.memory_space<vmem>>, vector<128x32xf32>
    %c0_1 = arith.constant 0 : index
    %c0_2 = arith.constant 0 : index
    %1 = vector.load %arg3[%c0_1, %c0_2] : memref<32x128xf32, #tpu.memory_space<vmem>>, vector<32x128xf32>
    %cst = arith.constant dense<0.000000e+00> : vector<128x128xf32>
    %2 = tpu.matmul %0, %1, %cst {dimension_numbers = #tpu.dot_dimension_numbers<[1], [0], [0], [1], [0, 0, 1, 1], [], []>} : vector<128x32xf32>, vector<32x128xf32>, vector<128x128xf32> -> vector<128x128xf32>
    %c0_3 = arith.constant 0 : index
    %c0_4 = arith.constant 0 : index
    %3 = vector.load %arg4[%c0_3, %c0_4] : memref<1x128xf32, #tpu.memory_space<vmem>>, vector<1x128xf32>
    %4 = vector.broadcast %3 : vector<1x128xf32> to vector<128x128xf32>
    %5 = arith.addf %2, %4 : vector<128x128xf32>
    %c0_5 = arith.constant 0 : index
    %c0_6 = arith.constant 0 : index
    %6 = vector.load %arg5[%c0_5, %c0_6] : memref<128x128xf32, #tpu.memory_space<vmem>>, vector<128x128xf32>
    tpu.vector_store %arg5[%c0_5, %c0_6], %5 {strides = array<i32>} : memref<128x128xf32, #tpu.memory_space<vmem>>, vector<128x128xf32>,
    return
  }
  func.func @transform_0(%arg0: i32, %arg1: i32) -> (i32, i32) {
    %c0_i32 = arith.constant 0 : i32
    %c0_i32_0 = arith.constant 0 : i32
    return %arg0, %c0_i32 : i32, i32
  }
  func.func @transform_1(%arg0: i32, %arg1: i32) -> (i32, i32) {
    %c0_i32 = arith.constant 0 : i32
    %c0_i32_0 = arith.constant 0 : i32
    return %c0_i32, %arg1 : i32, i32
  }
  func.func @transform_2(%arg0: i32, %arg1: i32) -> (i32, i32) {
    %c0_i32 = arith.constant 0 : i32
    %c0_i32_0 = arith.constant 0 : i32
    return %c0_i32, %arg1 : i32, i32
  }
  func.func @transform_3(%arg0: i32, %arg1: i32) -> (i32, i32) {
    %c0_i32 = arith.constant 0 : i32
    return %arg0, %arg1 : i32, i32
  }
}

</mosaic_0001>

<bundles_post_ra>
// kernel: lm_rnn_forward.3
= control target key start
LH: loop header
LB: loop body
LE: loop exit
PB: predicated region body
PF: predicated region fallthrough
CT: control target
= control target key end

     0   :  { %vm41_vm0 = vcmask 261120   ;;  %s483_s1 = inlined_call_operand.vmem [shape: f32[32,128], index: 1, kind: input, shape index: {}]   ;;  %s484_s0 = inlined_call_operand.vmem [shape: f32[128,32], index: 0, kind: input, shape index: {}]   ;;  %s485_s2 = inlined_call_operand.vmem [shape: f32[1,128], index: 2, kind: input, shape index: {}]   ;;  %s486_s3 = inlined_call_operand.vmem [shape: f32[128,128], index: 3, kind: output, shape index: {}]  }
   0x1   :  { %v30_v0 = vld [vmem:[%s483_s1] sm:$0xff]  ;;  %v31_v1 = vld [vmem:[%s483_s1 + $0x8] sm:$0xff]  ;;  %v32_v2 = vld [vmem:[%s483_s1 + $0x10] sm:$0xff] }
   0x2   :  { %v324_v3 = vpack.c.bf16 %v31_v1, %v30_v0  ;;  %v33_v4 = vld [vmem:[%s483_s1 + $0x18] sm:$0xff]  ;;  %v14_v5 = vld [vmem:[%s484_s0] sm:$0xff]  ;;  %v15_v8 = vld [vmem:[%s484_s0 + $0x8] sm:$0xff] }
   0x3   :  { %v22_v6 = vld [vmem:[%s484_s0 + $0x40] sm:$0xff]  ;;  %v328_v7 = vpack.c.bf16 %v33_v4, %v32_v2  ;;  %300 = vmatprep.mubr.msk.f32.mxu0 %vm41_vm0, %v14_v5  ;;  %v23_v9 = vld [vmem:[%s484_s0 + $0x48] sm:$0xff]  ;;  %v16_v10 = vld [vmem:[%s484_s0 + $0x10] sm:$0xff] }
   0x4   :  { %312 = vmatprep.mubr.msk.f32.mxu1 %vm41_vm0, %v22_v6  ;;  %325 = vmatprep.subr.bf16.mxu0 %v324_v3  ;;  %v24_v11 = vld [vmem:[%s484_s0 + $0x50] sm:$0xff]  ;;  %v17_v12 = vld [vmem:[%s484_s0 + $0x18] sm:$0xff]  ;;  %v18_v14 = vld [vmem:[%s484_s0 + $0x20] sm:$0xff] }
   0x5   :  { %332 = vmatprep.subr.bf16.mxu1 %v324_v3  ;;  %327 = vmatpush3.bf16.msra.mxu0 %v324_v3  ;;  %v25_v13 = vld [vmem:[%s484_s0 + $0x58] sm:$0xff]  ;;  %v26_v15 = vld [vmem:[%s484_s0 + $0x60] sm:$0xff]  ;;  %v19_v16 = vld [vmem:[%s484_s0 + $0x28] sm:$0xff] }
   0x6   :  { %334 = vmatpush3.bf16.msra.mxu1 %v324_v3  ;;  %329 = vmatprep.subr.bf16.mxu0 %v328_v7  ;;  %v27_v17 = vld [vmem:[%s484_s0 + $0x68] sm:$0xff]  ;;  %v20_v18 = vld [vmem:[%s484_s0 + $0x30] sm:$0xff]  ;;  %v21_v20 = vld [vmem:[%s484_s0 + $0x38] sm:$0xff] }
   0x7   :  { %333 = vmatprep.subr.bf16.mxu1 %v328_v7  ;;  %v28_v19 = vld [vmem:[%s484_s0 + $0x70] sm:$0xff]  ;;  %v29_v21 = vld [vmem:[%s484_s0 + $0x78] sm:$0xff]  ;;  %v255_v22 = vld [vmem:[%s485_s2] ss:$0 sm:$0xff] }
   0x9   :  { %331 = vmatpush3.bf16.msra.mxu0 %v328_v7 }
   0xa   :  { %335 = vmatpush3.bf16.msra.mxu1 %v328_v7 }
   0xc   :  { %301 = vmatmul.mubr.msk.f32.vlgmr.msra.gmra.mrb[0].mxu0 %vm41_vm0, %v15_v8 }
   0xd   :  { %313 = vmatmul.mubr.msk.f32.vlgmr.msra.gmra.mrb[0].mxu1 %vm41_vm0, %v23_v9  ;;  %303 = vmatprep.mubr.msk.f32.mxu0 %vm41_vm0, %v16_v10 }
   0xe   :  { %315 = vmatprep.mubr.msk.f32.mxu1 %vm41_vm0, %v24_v11 }
  0x10   :  { %304 = vmatmul.mubr.msk.f32.gmra.mrb[2].mxu0 %vm41_vm0, %v17_v12 }
  0x11   :  { %316 = vmatmul.mubr.msk.f32.gmra.mrb[2].mxu1 %vm41_vm0, %v25_v13  ;;  %306 = vmatprep.mubr.msk.f32.mxu0 %vm41_vm0, %v18_v14 }
  0x12   :  { %318 = vmatprep.mubr.msk.f32.mxu1 %vm41_vm0, %v26_v15 }
  0x14   :  { %307 = vmatmul.mubr.msk.f32.gmra.mrb[4].mxu0 %vm41_vm0, %v19_v16 }
  0x15   :  { %319 = vmatmul.mubr.msk.f32.gmra.mrb[4].mxu1 %vm41_vm0, %v27_v17  ;;  %309 = vmatprep.mubr.msk.f32.mxu0 %vm41_vm0, %v20_v18 }
  0x16   :  { %321 = vmatprep.mubr.msk.f32.mxu1 %vm41_vm0, %v28_v19 }
  0x18   :  { %310 = vmatmul.mubr.msk.f32.gmra.mrb[6].mxu0 %vm41_vm0, %v21_v20 }
  0x19   :  { %322 = vmatmul.mubr.msk.f32.gmra.mrb[6].mxu1 %vm41_vm0, %v29_v21 }
  0xdf   :  { %v302_v23 = vpop.f32.mrb[0].mxu0 }
  0xe0   :  { %v314_v24 = vpop.f32.mrb[0].mxu1  ;;  %v162_v25 = vadd.f32 %v302_v23, %v255_v22  ;;  %v156_v27 = vpop.f32.mrb[1].mxu0 }
  0xe1   :  { %v202_v26 = vadd.f32 %v314_v24, %v255_v22  ;;  %v196_v28 = vpop.f32.mrb[1].mxu1  ;;  %v157_v29 = vadd.f32 %v255_v22, %v156_v27 }
  0xe2   :  { %v197_v30 = vadd.f32 %v255_v22, %v196_v28  ;;  %236 = vst [vmem:[%s486_s3 + $0x8] sm:$0xff] %v162_v25 }
  0xe3   :  { %244 = vst [vmem:[%s486_s3 + $0x48] sm:$0xff] %v202_v26  ;;  %235 = vst [vmem:[%s486_s3] sm:$0xff] %v157_v29  ;;  %v305_v31 = vpop.f32.mrb[2].mxu0 }
  0xe4   :  { %243 = vst [vmem:[%s486_s3 + $0x40] sm:$0xff] %v197_v30  ;;  %v317_v32 = vpop.f32.mrb[2].mxu1  ;;  %v172_v33 = vadd.f32 %v305_v31, %v255_v22  ;;  %v166_v35 = vpop.f32.mrb[3].mxu0 }
  0xe5   :  { %v212_v34 = vadd.f32 %v317_v32, %v255_v22  ;;  %v206_v36 = vpop.f32.mrb[3].mxu1  ;;  %v167_v37 = vadd.f32 %v255_v22, %v166_v35 }
  0xe6   :  { %v207_v38 = vadd.f32 %v255_v22, %v206_v36  ;;  %238 = vst [vmem:[%s486_s3 + $0x18] sm:$0xff] %v172_v33 }
  0xe7   :  { %246 = vst [vmem:[%s486_s3 + $0x58] sm:$0xff] %v212_v34  ;;  %237 = vst [vmem:[%s486_s3 + $0x10] sm:$0xff] %v167_v37  ;;  %v308_v39 = vpop.f32.mrb[4].mxu0 }
  0xe8   :  { %245 = vst [vmem:[%s486_s3 + $0x50] sm:$0xff] %v207_v38  ;;  %v320_v40 = vpop.f32.mrb[4].mxu1  ;;  %v182_v41 = vadd.f32 %v308_v39, %v255_v22  ;;  %v176_v43 = vpop.f32.mrb[5].mxu0 }
  0xe9   :  { %v222_v42 = vadd.f32 %v320_v40, %v255_v22  ;;  %v216_v44 = vpop.f32.mrb[5].mxu1  ;;  %v177_v45 = vadd.f32 %v255_v22, %v176_v43 }
  0xea   :  { %v217_v46 = vadd.f32 %v255_v22, %v216_v44  ;;  %240 = vst [vmem:[%s486_s3 + $0x28] sm:$0xff] %v182_v41 }
  0xeb   :  { %248 = vst [vmem:[%s486_s3 + $0x68] sm:$0xff] %v222_v42  ;;  %239 = vst [vmem:[%s486_s3 + $0x20] sm:$0xff] %v177_v45  ;;  %v311_v47 = vpop.f32.mrb[6].mxu0 }
  0xec   :  { %247 = vst [vmem:[%s486_s3 + $0x60] sm:$0xff] %v217_v46  ;;  %v323_v48 = vpop.f32.mrb[6].mxu1  ;;  %v192_v49 = vadd.f32 %v311_v47, %v255_v22  ;;  %v186_v51 = vpop.f32.mrb[7].mxu0 }
  0xed   :  { %v232_v50 = vadd.f32 %v323_v48, %v255_v22  ;;  %v226_v52 = vpop.f32.mrb[7].mxu1  ;;  %v187_v53 = vadd.f32 %v255_v22, %v186_v51 }
  0xee   :  { %v227_v54 = vadd.f32 %v255_v22, %v226_v52  ;;  %242 = vst [vmem:[%s486_s3 + $0x38] sm:$0xff] %v192_v49 }
  0xef   :  { %250 = vst [vmem:[%s486_s3 + $0x78] sm:$0xff] %v232_v50  ;;  %241 = vst [vmem:[%s486_s3 + $0x30] sm:$0xff] %v187_v53 }
  0xf0   :  { %249 = vst [vmem:[%s486_s3 + $0x70] sm:$0xff] %v227_v54 }

// kernel: lm_rnn_forward.2
= control target key start
LH: loop header
LB: loop body
LE: loop exit
PB: predicated region body
PF: predicated region fallthrough
CT: control target
= control target key end

     0   :  { %vm15_vm0 = vcmask 261120   ;;  %v1034_v3 = vmov 0.0   ;;  %s1230_s1 = inlined_call_operand.vmem [shape: f32[32,32], index: 1, kind: input, shape index: {}]   ;;  %s1231_s0 = inlined_call_operand.vmem [shape: f32[8,16,32], index: 0, kind: input, shape index: {}]   ;;  %s1232_s2 = inlined_call_operand.vmem [shape: f32[8,16,32], index: 2, kind: output, shape index: {}]  }
   0x1   :  { %v18_v0 = vld [vmem:[%s1230_s1] sm:$0xff]  ;;  %v19_v1 = vld [vmem:[%s1230_s1 + $0x8] sm:$0xff]  ;;  %v20_v2 = vld [vmem:[%s1230_s1 + $0x10] sm:$0xff]  ;;  %16 = vst.msk [vmem:[#allocation2] sm:$0xff] %vm15_vm0, %v1034_v3 }
   0x2   :  { %17 = vst.msk [vmem:[#allocation2 + $0x8] sm:$0xff] %vm15_vm0, %v1034_v3  ;;  %v1061_v4 = vpack.c.bf16 %v19_v1, %v18_v0  ;;  %v21_v5 = vld [vmem:[%s1230_s1 + $0x18] sm:$0xff]  ;;  %v25_v9 = vld [vmem:[%s1231_s0 + $0x8] sm:$0xff]  ;;  %v24_v10 = vld [vmem:[%s1231_s0] sm:$0xff] }
   0x3   :  { %v1066_v6 = vpack.c.bf16 %v21_v5, %v20_v2  ;;  %v760_v17 = vld [vmem:[%s1231_s0 + $0x18] sm:$0xff]  ;;  %v759_v18 = vld [vmem:[%s1231_s0 + $0x10] sm:$0xff]  ;;  %v766_v25 = vld [vmem:[%s1231_s0 + $0x28] sm:$0xff] }
   0x4   :  { %938 = vmatprep.subr.bf16.mxu0 %v1061_v4  ;;  %946 = vmatprep.subr.bf16.mxu1 %v1061_v4  ;;  %v765_v26 = vld [vmem:[%s1231_s0 + $0x20] sm:$0xff]  ;;  %v772_v33 = vld [vmem:[%s1231_s0 + $0x38] sm:$0xff]  ;;  %v771_v34 = vld [vmem:[%s1231_s0 + $0x30] sm:$0xff] }
   0x5   :  { %940 = vmatpush3.bf16.msra.mxu0 %v1061_v4  ;;  %948 = vmatpush3.bf16.msra.mxu1 %v1061_v4  ;;  %v778_v41 = vld [vmem:[%s1231_s0 + $0x48] sm:$0xff]  ;;  %v777_v42 = vld [vmem:[%s1231_s0 + $0x40] sm:$0xff]  ;;  %v784_v49 = vld [vmem:[%s1231_s0 + $0x58] sm:$0xff] }
   0x6   :  { %942 = vmatprep.subr.bf16.mxu0 %v1066_v6  ;;  %950 = vmatprep.subr.bf16.mxu1 %v1066_v6  ;;  %v783_v50 = vld [vmem:[%s1231_s0 + $0x50] sm:$0xff]  ;;  %v790_v57 = vld [vmem:[%s1231_s0 + $0x68] sm:$0xff]  ;;  %v789_v58 = vld [vmem:[%s1231_s0 + $0x60] sm:$0xff] }
   0x7   :  { %v796_v1 = vld [vmem:[%s1231_s0 + $0x78] sm:$0xff]  ;;  %v795_v2 = vld [vmem:[%s1231_s0 + $0x70] sm:$0xff] }
   0x8   :  { %v22_v7 = vld [vmem:[#allocation2] sm:$0xff] }
   0x9   :  { %944 = vmatpush3.bf16.msra.mxu0 %v1066_v6  ;;  %857 = vmatprep.mubr.msk.f32.mxu0 %vm15_vm0, %v22_v7  ;;  %v23_v8 = vld [vmem:[#allocation2 + $0x8] sm:$0xff] }
   0xa   :  { %952 = vmatpush3.bf16.msra.mxu1 %v1066_v6  ;;  %954 = vmatprep.subr.bf16.mxu0 %v1061_v4 }
   0xb   :  { %962 = vmatprep.subr.bf16.mxu1 %v1061_v4 }
   0xc   :  { %858 = vmatmul.mubr.msk.f32.vlgmr.msra.gmra.mrb[0].mxu0 %vm15_vm0, %v23_v8 }
   0xd   :  { %956 = vmatpush3.bf16.msra.mxu0 %v1061_v4 }
   0xe   :  { %958 = vmatprep.subr.bf16.mxu0 %v1066_v6 }
  0x11   :  { %960 = vmatpush3.bf16.msra.mxu0 %v1066_v6 }
  0x12   :  { %970 = vmatprep.subr.bf16.mxu0 %v1061_v4 }
  0xdf   :  { %v859_v11 = vpop.f32.mrb[0].mxu0 }
  0xe0   :  { %v109_v12 = vadd.f32 %v859_v11, %v25_v9  ;;  %v99_v13 = vpop.f32.mrb[1].mxu0 }
  0xe1   :  { %v108_v14 = vadd.f32 %v99_v13, %v24_v10 }
  0xe2   :  { %1002 = vtanh.f32 %v109_v12 }
  0xe3   :  { %1004 = vtanh.f32 %v108_v14 }
  0xec   :  { %v1003_v15 = vpop.eup %1002 }
  0xed   :  { %v1005_v16 = vpop.eup %1004  ;;  %113 = vst.msk [vmem:[%s1232_s2 + $0x8] sm:$0xff] %vm15_vm0, %v1003_v15 }
  0xee   :  { %112 = vst.msk [vmem:[%s1232_s2] sm:$0xff] %vm15_vm0, %v1005_v16  ;;  %868 = vmatprep.mubr.msk.f32.mxu1 %vm15_vm0, %v1005_v16 }
  0xef   :  { %869 = vmatmul.mubr.msk.f32.vlgmr.msra.gmra.mrb[0].mxu1 %vm15_vm0, %v1003_v15 }
  0xf0   :  { %964 = vmatpush3.bf16.msra.mxu1 %v1061_v4 }
  0xf1   :  { %966 = vmatprep.subr.bf16.mxu1 %v1066_v6 }
  0xf4   :  { %968 = vmatpush3.bf16.msra.mxu1 %v1066_v6 }
  0xf5   :  { %978 = vmatprep.subr.bf16.mxu1 %v1061_v4 }
 0x1c2   :  { %v870_v19 = vpop.f32.mrb[0].mxu1 }
 0x1c3   :  { %v199_v20 = vadd.f32 %v870_v19, %v760_v17  ;;  %v189_v21 = vpop.f32.mrb[1].mxu1 }
 0x1c4   :  { %v198_v22 = vadd.f32 %v759_v18, %v189_v21 }
 0x1c5   :  { %1006 = vtanh.f32 %v199_v20 }
 0x1c6   :  { %1008 = vtanh.f32 %v198_v22 }
 0x1cf   :  { %v1007_v23 = vpop.eup %1006 }
 0x1d0   :  { %v1009_v24 = vpop.eup %1008  ;;  %764 = vst.msk [vmem:[%s1232_s2 + $0x18] sm:$0xff] %vm15_vm0, %v1007_v23 }
 0x1d1   :  { %763 = vst.msk [vmem:[%s1232_s2 + $0x10] sm:$0xff] %vm15_vm0, %v1009_v24  ;;  %879 = vmatprep.mubr.msk.f32.mxu0 %vm15_vm0, %v1009_v24 }
 0x1d2   :  { %880 = vmatmul.mubr.msk.f32.vlgmr.msra.gmra.mrb[2].mxu0 %vm15_vm0, %v1007_v23 }
 0x1d3   :  { %972 = vmatpush3.bf16.msra.mxu0 %v1061_v4 }
 0x1d4   :  { %974 = vmatprep.subr.bf16.mxu0 %v1066_v6 }
 0x1d7   :  { %976 = vmatpush3.bf16.msra.mxu0 %v1066_v6 }
 0x1d8   :  { %986 = vmatprep.subr.bf16.mxu0 %v1061_v4 }
 0x2a5   :  { %v881_v27 = vpop.f32.mrb[2].mxu0 }
 0x2a6   :  { %v290_v28 = vadd.f32 %v881_v27, %v766_v25  ;;  %v280_v29 = vpop.f32.mrb[3].mxu0 }
 0x2a7   :  { %v289_v30 = vadd.f32 %v765_v26, %v280_v29 }
 0x2a8   :  { %1010 = vtanh.f32 %v290_v28 }
 0x2a9   :  { %1012 = vtanh.f32 %v289_v30 }
 0x2b2   :  { %v1011_v31 = vpop.eup %1010 }
 0x2b3   :  { %v1013_v32 = vpop.eup %1012  ;;  %770 = vst.msk [vmem:[%s1232_s2 + $0x28] sm:$0xff] %vm15_vm0, %v1011_v31 }
 0x2b4   :  { %769 = vst.msk [vmem:[%s1232_s2 + $0x20] sm:$0xff] %vm15_vm0, %v1013_v32  ;;  %890 = vmatprep.mubr.msk.f32.mxu1 %vm15_vm0, %v1013_v32 }
 0x2b5   :  { %891 = vmatmul.mubr.msk.f32.vlgmr.msra.gmra.mrb[2].mxu1 %vm15_vm0, %v1011_v31 }
 0x2b6   :  { %980 = vmatpush3.bf16.msra.mxu1 %v1061_v4 }
 0x2b7   :  { %982 = vmatprep.subr.bf16.mxu1 %v1066_v6 }
 0x2ba   :  { %984 = vmatpush3.bf16.msra.mxu1 %v1066_v6 }
 0x2bb   :  { %994 = vmatprep.subr.bf16.mxu1 %v1061_v4 }
 0x388   :  { %v892_v35 = vpop.f32.mrb[2].mxu1 }
 0x389   :  { %v381_v36 = vadd.f32 %v892_v35, %v772_v33  ;;  %v371_v37 = vpop.f32.mrb[3].mxu1 }
 0x38a   :  { %v380_v38 = vadd.f32 %v771_v34, %v371_v37 }
 0x38b   :  { %1014 = vtanh.f32 %v381_v36 }
 0x38c   :  { %1016 = vtanh.f32 %v380_v38 }
 0x395   :  { %v1015_v39 = vpop.eup %1014 }
 0x396   :  { %v1017_v40 = vpop.eup %1016  ;;  %776 = vst.msk [vmem:[%s1232_s2 + $0x38] sm:$0xff] %vm15_vm0, %v1015_v39 }
 0x397   :  { %775 = vst.msk [vmem:[%s1232_s2 + $0x30] sm:$0xff] %vm15_vm0, %v1017_v40  ;;  %901 = vmatprep.mubr.msk.f32.mxu0 %vm15_vm0, %v1017_v40 }
 0x398   :  { %902 = vmatmul.mubr.msk.f32.vlgmr.msra.gmra.mrb[4].mxu0 %vm15_vm0, %v1015_v39 }
 0x399   :  { %988 = vmatpush3.bf16.msra.mxu0 %v1061_v4 }
 0x39a   :  { %990 = vmatprep.subr.bf16.mxu0 %v1066_v6 }
 0x39d   :  { %992 = vmatpush3.bf16.msra.mxu0 %v1066_v6 }
 0x46b   :  { %v903_v43 = vpop.f32.mrb[4].mxu0 }
 0x46c   :  { %v472_v44 = vadd.f32 %v903_v43, %v778_v41  ;;  %v462_v45 = vpop.f32.mrb[5].mxu0 }
 0x46d   :  { %v471_v46 = vadd.f32 %v777_v42, %v462_v45 }
 0x46e   :  { %1018 = vtanh.f32 %v472_v44 }
 0x46f   :  { %1020 = vtanh.f32 %v471_v46 }
 0x478   :  { %v1019_v47 = vpop.eup %1018 }
 0x479   :  { %v1021_v48 = vpop.eup %1020  ;;  %782 = vst.msk [vmem:[%s1232_s2 + $0x48] sm:$0xff] %vm15_vm0, %v1019_v47 }
 0x47a   :  { %781 = vst.msk [vmem:[%s1232_s2 + $0x40] sm:$0xff] %vm15_vm0, %v1021_v48  ;;  %912 = vmatprep.mubr.msk.f32.mxu1 %vm15_vm0, %v1021_v48 }
 0x47b   :  { %913 = vmatmul.mubr.msk.f32.vlgmr.msra.gmra.mrb[4].mxu1 %vm15_vm0, %v1019_v47 }
 0x47c   :  { %996 = vmatpush3.bf16.msra.mxu1 %v1061_v4 }
 0x47d   :  { %998 = vmatprep.subr.bf16.mxu1 %v1066_v6 }
 0x480   :  { %1000 = vmatpush3.bf16.msra.mxu1 %v1066_v6 }
 0x54e   :  { %v914_v51 = vpop.f32.mrb[4].mxu1 }
 0x54f   :  { %v563_v52 = vadd.f32 %v914_v51, %v784_v49  ;;  %v553_v53 = vpop.f32.mrb[5].mxu1 }
 0x550   :  { %v562_v54 = vadd.f32 %v783_v50, %v553_v53 }
 0x551   :  { %1022 = vtanh.f32 %v563_v52 }
 0x552   :  { %1024 = vtanh.f32 %v562_v54 }
 0x55b   :  { %v1023_v55 = vpop.eup %1022 }
 0x55c   :  { %v1025_v56 = vpop.eup %1024  ;;  %788 = vst.msk [vmem:[%s1232_s2 + $0x58] sm:$0xff] %vm15_vm0, %v1023_v55 }
 0x55d   :  { %787 = vst.msk [vmem:[%s1232_s2 + $0x50] sm:$0xff] %vm15_vm0, %v1025_v56  ;;  %923 = vmatprep.mubr.msk.f32.mxu0 %vm15_vm0, %v1025_v56 }
 0x55e   :  { %924 = vmatmul.mubr.msk.f32.vlgmr.msra.gmra.mrb[6].mxu0 %vm15_vm0, %v1023_v55 }
 0x631   :  { %v925_v59 = vpop.f32.mrb[6].mxu0 }
 0x632   :  { %v654_v60 = vadd.f32 %v925_v59, %v790_v57  ;;  %v644_v61 = vpop.f32.mrb[7].mxu0 }
 0x633   :  { %v653_v62 = vadd.f32 %v789_v58, %v644_v61 }
 0x634   :  { %1026 = vtanh.f32 %v654_v60 }
 0x635   :  { %1028 = vtanh.f32 %v653_v62 }
 0x63e   :  { %v1027_v63 = vpop.eup %1026 }
 0x63f   :  { %v1029_v0 = vpop.eup %1028  ;;  %794 = vst.msk [vmem:[%s1232_s2 + $0x68] sm:$0xff] %vm15_vm0, %v1027_v63 }
 0x640   :  { %793 = vst.msk [vmem:[%s1232_s2 + $0x60] sm:$0xff] %vm15_vm0, %v1029_v0  ;;  %934 = vmatprep.mubr.msk.f32.mxu1 %vm15_vm0, %v1029_v0 }
 0x641   :  { %935 = vmatmul.mubr.msk.f32.vlgmr.msra.gmra.mrb[6].mxu1 %vm15_vm0, %v1027_v63 }
 0x714   :  { %v936_v3 = vpop.f32.mrb[6].mxu1 }
 0x715   :  { %v745_v4 = vadd.f32 %v936_v3, %v796_v1  ;;  %v735_v5 = vpop.f32.mrb[7].mxu1 }
 0x716   :  { %v744_v6 = vadd.f32 %v795_v2, %v735_v5 }
 0x717   :  { %1030 = vtanh.f32 %v745_v4 }
 0x718   :  { %1032 = vtanh.f32 %v744_v6 }
 0x721   :  { %v1031_v7 = vpop.eup %1030 }
 0x722   :  { %v1033_v8 = vpop.eup %1032  ;;  %800 = vst.msk [vmem:[%s1232_s2 + $0x78] sm:$0xff] %vm15_vm0, %v1031_v7  ;;  %752 = vst.msk [vmem:[#allocation2 + $0x8] sm:$0xff] %vm15_vm0, %v1031_v7 }
 0x723   :  { %799 = vst.msk [vmem:[%s1232_s2 + $0x70] sm:$0xff] %vm15_vm0, %v1033_v8  ;;  %751 = vst.msk [vmem:[#allocation2] sm:$0xff] %vm15_vm0, %v1033_v8 }

</bundles_post_ra>
